<compile_context>
chip_gen: v7x
topology: tpu7x:2x2x1
jax: 0.10.0
libtpu: 0.0.40
codegen_flags: <defaults>
</compile_context>

<pallas_src>
import functools
import math

import jax
import jax.numpy as jnp
from jax.experimental import pallas as pl
from jax.experimental.pallas import tpu as pltpu


def _round_up(x, m):
    return ((x + m - 1) // m) * m


def _skiplast_mse_kernel(x_ref, t_ref, out_ref, *, bn, tile_cols, n_rows,
                         total_cols, col_edge_start, row_edge):
    """One grid step: fold a (bn, tile_cols) tile of squared error into the
    per-(split,row) accumulator.

    x_ref  : (bn, tile_cols) predictions (native dtype)
    t_ref  : (bn, tile_cols) matching target columns (the skipped channel is
             never DMA'd -- it lives past column total_cols of the flattened
             target and no column tile reaches it)
    out_ref: (1, bn, 1) f32 per-sample running sum, resident across the column
             grid axis.
    """
    s = pl.program_id(0)          # column split (keeps both v7x TCs busy)
    r = pl.program_id(1)          # row (sample) tile
    tc = pl.program_id(2)         # column tile within this split
    half = pl.num_programs(2)

    @pl.when(tc == 0)
    def _init():
        out_ref[...] = jnp.zeros_like(out_ref)

    x = x_ref[...].astype(jnp.float32)
    t = t_ref[...].astype(jnp.float32)
    d = x - t
    sq = d * d                                  # (bn, tile_cols)

    g = s * half + tc                           # global column-tile index

    def _accum(vals):
        out_ref[...] += jnp.sum(vals, axis=-1, keepdims=True)[None]

    conds = []
    if col_edge_start is not None:
        conds.append(g >= col_edge_start)
    if row_edge:
        conds.append(r == pl.num_programs(1) - 1)

    if not conds:
        # No ragged tiles anywhere: mask-free steady state.
        _accum(sq)
    else:
        edge = conds[0]
        for c in conds[1:]:
            edge = jnp.logical_or(edge, c)

        @pl.when(jnp.logical_not(edge))
        def _interior():
            _accum(sq)

        @pl.when(edge)
        def _edge():
            mask = None
            if col_edge_start is not None:
                lane = jax.lax.broadcasted_iota(jnp.int32, sq.shape, 1)
                mask = g * tile_cols + lane < total_cols
            if row_edge:
                row = jax.lax.broadcasted_iota(jnp.int32, sq.shape, 0)
                rm = r * bn + row < n_rows
                mask = rm if mask is None else jnp.logical_and(mask, rm)
            # where (select), not multiply: undefined overhang may hold NaN/inf.
            _accum(jnp.where(mask, sq, 0.0))


def skip_last_target_channel_mse(inp, target, squeeze_channel=False,
                                 reduction="mean", tile_cols=None):
    """SkipLastTargetChannelWrapper(MSELoss()) forward.

    inp:    (N, C, *spatial) predictions
    target: (N, C+1, *spatial) targets (last channel dropped before the loss)
    Returns scalar mean((inp - target[:, :-1, ...])**2)   (or sum).
    """
    assert target.shape[1] > 1, (
        "Target tensor has a singleton channel dimension, cannot remove channel")

    # torch.squeeze(dim=1) only removes the channel when exactly one remains
    # after the slice (target originally had 2 channels); otherwise it is a
    # silent no-op, matching PyTorch.
    if squeeze_channel and target.shape[1] == 2 and inp.ndim == target.ndim - 1:
        inp = inp[:, None, ...]

    assert inp.ndim == target.ndim
    N, C = inp.shape[0], inp.shape[1]
    Ct = target.shape[1]
    assert Ct == C + 1, "target must have exactly one extra channel"
    assert target.shape[0] == N and target.shape[2:] == inp.shape[2:]

    spatial = inp.shape[2:]
    hw = int(math.prod(spatial)) if spatial else 1
    total_cols = C * hw

    # Free reshapes (no HBM copy): samples on rows (sublanes), channels*pixels
    # on columns (lanes).  The target keeps its extra channel, but it lives
    # past column total_cols, so the column-tiled blocks never DMA it.
    x2 = inp.reshape(N, total_cols)
    t2 = target.reshape(N, Ct * hw)

    # Row (sample) blocking: 8 sublanes, or the full (small) batch.
    if N <= 8:
        bn, n_row_tiles, row_edge = N, 1, False
    else:
        bn = 8
        n_row_tiles = pl.cdiv(N, bn)
        row_edge = (N % bn) != 0

    # Column tile: lane-dense multiple of 128, sized from dtype + batch so one
    # step moves ~4 MiB of combined input+target; capped so the double-buffered
    # footprint stays < ~12 MiB (safe for every generation's default scoped VMEM).
    isz = inp.dtype.itemsize + target.dtype.itemsize
    if tile_cols is None:
        step_bytes = 4 * 1024 * 1024
        tile_cols = step_bytes // max(1, bn * isz)
    tile_cols = max(512, (int(tile_cols) // 128) * 128)
    vmem_cap_cols = (12 * 1024 * 1024) // (2 * max(1, bn * isz))
    tile_cols = min(tile_cols, max(128, (vmem_cap_cols // 128) * 128))
    if total_cols >= 128:
        tile_cols = min(tile_cols, (total_cols // 128) * 128)
    else:
        tile_cols = 128        # single (over-hanging) block; masked in-kernel

    num_ct = pl.cdiv(total_cols, tile_cols)

    # 2-way column split so both v7x TensorCores have work even when N == 1.
    n_split = 2 if num_ct >= 2 else 1
    half = pl.cdiv(num_ct, n_split)

    # Static bookkeeping for the (edge-only) in-kernel masks.
    if total_cols % tile_cols != 0:
        col_edge_start = num_ct - 1        # last column tile is ragged
    elif n_split * half != num_ct:
        col_edge_start = num_ct            # only fully out-of-range tiles
    else:
        col_edge_start = None

    if n_split * half == num_ct:
        def col_idx(s, t):
            return s * half + t
    else:
        def col_idx(s, t):                 # clamp fully-OOB tiles; masked to 0 in-kernel
            return jnp.minimum(s * half + t, num_ct - 1)

    kernel = functools.partial(
        _skiplast_mse_kernel, bn=bn, tile_cols=tile_cols, n_rows=N,
        total_cols=total_cols, col_edge_start=col_edge_start, row_edge=row_edge)

    out_rows = n_row_tiles * bn
    cost = pl.CostEstimate(
        flops=int(3 * N * total_cols),
        transcendentals=0,
        bytes_accessed=int(N * total_cols * isz + n_split * out_rows * 4))

    partials = pl.pallas_call(
        kernel,
        out_shape=jax.ShapeDtypeStruct((n_split, out_rows, 1), jnp.float32),
        grid_spec=pltpu.PrefetchScalarGridSpec(
            num_scalar_prefetch=0,
            grid=(n_split, n_row_tiles, half),
            in_specs=[
                pl.BlockSpec((bn, tile_cols), lambda s, r, t: (r, col_idx(s, t))),
                pl.BlockSpec((bn, tile_cols), lambda s, r, t: (r, col_idx(s, t))),
            ],
            out_specs=pl.BlockSpec((1, bn, 1), lambda s, r, t: (s, r, 0)),
        ),
        compiler_params=pltpu.CompilerParams(
            dimension_semantics=("parallel", "parallel", "arbitrary")),
        cost_estimate=cost,
    )(x2, t2)

    total = jnp.sum(partials)
    if reduction == "mean":
        return total / float(N * total_cols)
    elif reduction == "sum":
        return total
    else:
        raise ValueError("reduction must be 'mean' or 'sum'")


if __name__ == "__main__":
    key = jax.random.PRNGKey(0)
    k1, k2, k3, k4, k5, k6 = jax.random.split(key, 6)

    # Case 1: standard wrapper use — input (N,C,H,W), target (N,C+1,H,W).
    N, C, H, W = 2, 4, 16, 16
    x = jax.random.normal(k1, (N, C, H, W), dtype=jnp.float32)
    tgt = jax.random.normal(k2, (N, C + 1, H, W), dtype=jnp.float32)
    out = jax.block_until_ready(skip_last_target_channel_mse(x, tgt))
    ref = jnp.mean((x - tgt[:, :-1]) ** 2)
    assert out.shape == ()
    assert jnp.allclose(out, ref, atol=1e-5, rtol=1e-5), (out, ref)

    # Case 2: squeeze_channel=True — target has 2 channels, input has no channel dim.
    x2 = jax.random.normal(k3, (N, H, W), dtype=jnp.float32)
    tgt2 = jax.random.normal(k4, (N, 2, H, W), dtype=jnp.float32)
    out2 = jax.block_until_ready(
        skip_last_target_channel_mse(x2, tgt2, squeeze_channel=True))
    ref2 = jnp.mean((x2 - jnp.squeeze(tgt2[:, :-1], axis=1)) ** 2)
    assert jnp.allclose(out2, ref2, atol=1e-5, rtol=1e-5), (out2, ref2)

    # Case 3: ragged rows and ragged columns + 2-way split (exercises masks).
    N3, C3, H3, W3 = 10, 3, 7, 9
    x3 = jax.random.normal(k5, (N3, C3, H3, W3), dtype=jnp.float32)
    tgt3 = jax.random.normal(k6, (N3, C3 + 1, H3, W3), dtype=jnp.float32)
    out3 = jax.block_until_ready(skip_last_target_channel_mse(x3, tgt3))
    ref3 = jnp.mean((x3 - tgt3[:, :-1]) ** 2)
    assert jnp.allclose(out3, ref3, atol=1e-5, rtol=1e-5), (out3, ref3)

    print("KERNEL_OK")
</pallas_src>

<mosaic_0001>
module attributes {stable_mosaic.version = 11 : i64} {
  func.func @_skiplast_mse_kernel(%arg0: i32, %arg1: i32, %arg2: i32, %arg3: memref<2x1024xf32, #tpu.memory_space<vmem>>, %arg4: memref<2x1024xf32, #tpu.memory_space<vmem>>, %arg5: memref<1x2x1xf32, #tpu.memory_space<vmem>>) attributes {dimension_semantics = [#tpu.dimension_semantics<parallel>, #tpu.dimension_semantics<parallel>, #tpu.dimension_semantics<arbitrary>], iteration_bounds = array<i64: 1, 1, 1>, scalar_prefetch = 0 : i64, scratch_operands = 0 : i64, tpu.core_type = #tpu.core_type<tc>, window_params = [{transform_indices = @transform_0, window_bounds = array<i64: 2, 1024>}, {transform_indices = @transform_1, window_bounds = array<i64: 2, 1024>}, {transform_indices = @transform_2, window_bounds = array<i64: 1, 2, 1>}]} {
    %c0_i32 = arith.constant 0 : i32
    %0 = arith.cmpi eq, %arg2, %c0_i32 : i32
    %1 = arith.extui %0 : i1 to i32
    %c0_i32_0 = arith.constant 0 : i32
    %2 = arith.cmpi ne, %1, %c0_i32_0 : i32
    scf.if %2 {
      %cst_10 = arith.constant 0.000000e+00 : f32
      %13 = vector.broadcast %cst_10 : f32 to vector<1x2x1xf32>
      %c0_11 = arith.constant 0 : index
      %c0_12 = arith.constant 0 : index
      %c0_13 = arith.constant 0 : index
      %14 = vector.load %arg5[%c0_11, %c0_12, %c0_13] : memref<1x2x1xf32, #tpu.memory_space<vmem>>, vector<1x2x1xf32>
      tpu.vector_store %arg5[%c0_11, %c0_12, %c0_13], %13 {strides = array<i32>} : memref<1x2x1xf32, #tpu.memory_space<vmem>>, vector<1x2x1xf32>,
    } else {
    }
    %c0 = arith.constant 0 : index
    %c0_1 = arith.constant 0 : index
    %3 = vector.load %arg3[%c0, %c0_1] : memref<2x1024xf32, #tpu.memory_space<vmem>>, vector<2x1024xf32>
    %c0_2 = arith.constant 0 : index
    %c0_3 = arith.constant 0 : index
    %4 = vector.load %arg4[%c0_2, %c0_3] : memref<2x1024xf32, #tpu.memory_space<vmem>>, vector<2x1024xf32>
    %5 = arith.subf %3, %4 : vector<2x1024xf32>
    %6 = arith.mulf %5, %5 : vector<2x1024xf32>
    %c0_4 = arith.constant 0 : index
    %c0_5 = arith.constant 0 : index
    %c0_6 = arith.constant 0 : index
    %7 = vector.load %arg5[%c0_4, %c0_5, %c0_6] : memref<1x2x1xf32, #tpu.memory_space<vmem>>, vector<1x2x1xf32>
    %cst = arith.constant dense<0.000000e+00> : vector<2xf32>
    %8 = vector.multi_reduction <add>, %6, %cst [1] : vector<2x1024xf32> to vector<2xf32>
    %9 = vector.shape_cast %8 : vector<2xf32> to vector<2x1xf32>
    %10 = vector.shape_cast %9 : vector<2x1xf32> to vector<1x2x1xf32>
    %11 = arith.addf %7, %10 : vector<1x2x1xf32>
    %c0_7 = arith.constant 0 : index
    %c0_8 = arith.constant 0 : index
    %c0_9 = arith.constant 0 : index
    %12 = vector.load %arg5[%c0_7, %c0_8, %c0_9] : memref<1x2x1xf32, #tpu.memory_space<vmem>>, vector<1x2x1xf32>
    tpu.vector_store %arg5[%c0_7, %c0_8, %c0_9], %11 {strides = array<i32>} : memref<1x2x1xf32, #tpu.memory_space<vmem>>, vector<1x2x1xf32>,
    return
  }
  func.func @transform_0(%arg0: i32, %arg1: i32, %arg2: i32) -> (i32, i32) {
    %c1_i32 = arith.constant 1 : i32
    %0 = arith.muli %arg0, %c1_i32 : i32
    %1 = arith.addi %0, %arg2 : i32
    %c0_i32 = arith.constant 0 : i32
    return %arg1, %1 : i32, i32
  }
  func.func @transform_1(%arg0: i32, %arg1: i32, %arg2: i32) -> (i32, i32) {
    %c1_i32 = arith.constant 1 : i32
    %0 = arith.muli %arg0, %c1_i32 : i32
    %1 = arith.addi %0, %arg2 : i32
    %c0_i32 = arith.constant 0 : i32
    return %arg1, %1 : i32, i32
  }
  func.func @transform_2(%arg0: i32, %arg1: i32, %arg2: i32) -> (i32, i32, i32) {
    %c0_i32 = arith.constant 0 : i32
    %c0_i32_0 = arith.constant 0 : i32
    return %arg0, %arg1, %c0_i32 : i32, i32, i32
  }
}

</mosaic_0001>

<bundles_post_ra>
// kernel: tpu_custom_call.1
= control target key start
LH: loop header
LB: loop body
LE: loop exit
PB: predicated region body
PF: predicated region fallthrough
CT: control target
= control target key end

     0   :  { %7 = vsyncpa [#allocation3], 0  ;;  %s267_s0 = inlined_call_operand.hbm [shape: f32[2,1024], index: 0, kind: input, shape index: {}]   ;;  %s268_s1 = inlined_call_operand.hbm [shape: f32[2,1280], index: 1, kind: input, shape index: {}]   ;;  %s269_s2 = inlined_call_operand.vmem [shape: f32[1,2,1], index: 2, kind: output, shape index: {}]  }
   0x1   :  { %8 = vsyncpa [#allocation5], 0  ;;  %s195_s9 = smov [#allocation2]   ;;  %s196_s11 = smov [#allocation4]  }
   0x2   :  { %s19_s10 = sshll.u32 %s195_s9, 4  ;;  %s39_s12 = sshll.u32 %s196_s11, 4  ;;  %s20_s10 = int_to_ptr.vmem [resolvable:$true] %s19_s10  ;;  %s214_s12 = int_to_ptr.vmem [resolvable:$true] %s39_s12 }
   0x3   :  { %s147_s15 = scalar_lea.hbm %s267_s0, 256 }
   0x4   :  { %p148_p0 = scmp.ne.s32.totalorder %s267_s0, %s147_s15  ;;  %p151_p1 = scmp.lt.u32.totalorder %s147_s15, %s267_s0 }
   0x6   :  { %p153_p2 = pnand %p151_p1, %p148_p0 }
   0x8   :  { %156 = shalt.err (!%p153_p2)
}
   0x9   :  { %s157_s20 = scalar_lea.vmem %s20_s10, 256  ;;  %p162_p4 = scmp.lt.s32.totalorder %s20_s10, %s20_s10 }
   0xa   :  { %p158_p3 = scmp.ne.s32.totalorder %s20_s10, %s157_s20  ;;  %p163_p5 = scmp.lt.s32.totalorder %s157_s20, %s157_s20 }
   0xc   :  { %p164_p6 = por %p163_p5, %p162_p4 }
   0xe   :  { %p165_p7 = pnand %p164_p6, %p158_p3 }
  0x10   :  { %168 = shalt.err (!%p165_p7)
}
  0x11   :  { %22 = dma.hbm_to_vmem [thread:$0]  %s267_s0, 256, %s20_s10, [#allocation3]  }
  0x12   :  { %s169_s25 = scalar_lea.hbm %s268_s1, 256  ;;  %s171_s30 = scalar_lea.hbm %s268_s1, 320 }
  0x13   :  { %p170_p8 = scmp.ne.s32.totalorder %s268_s1, %s169_s25  ;;  %p172_p9 = scmp.lt.u32.totalorder %s171_s30, %s169_s25 }
  0x14   :  { %p173_p10 = scmp.lt.u32.totalorder %s169_s25, %s268_s1 }
  0x16   :  { %p174_p11 = por %p173_p10, %p172_p9 }
  0x18   :  { %p175_p12 = pnand %p174_p11, %p170_p8 }
  0x1a   :  { %178 = shalt.err (!%p175_p12)
}
  0x1b   :  { %s179_s0 = scalar_lea.vmem %s214_s12, 256  ;;  %p184_p0 = scmp.lt.s32.totalorder %s214_s12, %s214_s12 }
  0x1c   :  { %p180_p13 = scmp.ne.s32.totalorder %s214_s12, %s179_s0  ;;  %p185_p1 = scmp.lt.s32.totalorder %s179_s0, %s179_s0 }
  0x1e   :  { %p186_p2 = por %p185_p1, %p184_p0 }
  0x20   :  { %p187_p3 = pnand %p186_p2, %p180_p13 }
  0x22   :  { %190 = shalt.err (!%p187_p3)
}
  0x23   :  { %42 = dma.hbm_to_vmem [thread:$0]  %s268_s1, 256, %s214_s12, [#allocation5]  }
  0x24   :  { %191 = dma.done.wait [#allocation3], 256  }
  0x25   :  { %192 = vsyncadd [#allocation3], 4294967040 }
  0x26   :  { %193 = dma.done.wait [#allocation5], 256  }
  0x27   :  { %194 = vsyncadd [#allocation5], 4294967040  ;;  %vm61_vm0 = vcmask 1024   ;;  %v78_v0 = vlaneseq  ;;  %v197_v1 = vmov 0.0   ;;  %v198_v2 = vmov 1983009808  }
  0x28   :  { %62 = vst.msk [vmem:[%s269_s2] sm:$0x3] %vm61_vm0, %v197_v1  ;;  %v76_v3 = vunpack.c.l.s4 %v198_v2  ;;  %v63_v6 = vld [vmem:[#allocation2] sm:$0xff]  ;;  %v64_v7 = vld [vmem:[#allocation2 + $0x8] sm:$0xff]  ;;  %v65_v8 = vld [vmem:[#allocation4] sm:$0xff]  ;;  %vm116_vm1 = vcmask 1041408  }
  0x29   :  { %v79_v5 = vshrl.u32 %v78_v0, 7  ;;  %v66_v9 = vld [vmem:[#allocation4 + $0x8] sm:$0xff]  ;;  %v67_v10 = vsub.f32 %v63_v6, %v65_v8 }
  0x2a   :  { %v77_v4 = vunpack.c.0.s8 %v76_v3  ;;  %v68_v12 = vsub.f32 %v64_v7, %v66_v9 }
  0x2b   :  { %v69_v13 = vmul.f32 %v67_v10, %v67_v10 }
  0x2c   :  { %v80_v11 = vsub.s32 %v77_v4, %v79_v5  ;;  %v70_v14 = vmul.f32 %v68_v12, %v68_v12 }
  0x2d   :  { %v74_v15 = vcombine.high %v69_v13, %v69_v13 }
  0x2e   :  { %v81_v16 = vrot.slane %v69_v13, %v80_v11  ;;  %v91_v17 = vcombine.high %v70_v14, %v70_v14  ;;  %v98_v20 = vrot.slane %v70_v14, %v80_v11 }
  0x2f   :  { %v88_v18 = vrot.slane %v74_v15, %v80_v11  ;;  %v71_v40 = vld [vmem:[%s269_s2] sm:$0x3] }
  0x30   :  { %v89_v19 = vcombine.high %v81_v16, %v81_v16  ;;  %v117_v21 = vsel %vm116_vm1, %v81_v16, 0.0  ;;  %v105_v26 = vrot.slane %v91_v17, %v80_v11  ;;  %v106_v27 = vcombine.high %v98_v20, %v98_v20 }
  0x31   :  { %v90_v22 = vcombine.high %v88_v18, %v88_v18  ;;  %v120_v24 = vsel %vm116_vm1, %v88_v18, 0.0  ;;  %v124_v30 = vsel %vm116_vm1, %v98_v20, 0.0 }
  0x32   :  { %v118_v23 = vsel %vm116_vm1, %v89_v19, 0.0  ;;  %v107_v32 = vcombine.high %v105_v26, %v105_v26  ;;  %v126_v33 = vsel %vm116_vm1, %v106_v27, 0.0  ;;  %v128_v35 = vsel %vm116_vm1, %v105_v26, 0.0 }
  0x33   :  { %v119_v25 = vadd.f32 %v118_v23, %v117_v21  ;;  %v122_v28 = vsel %vm116_vm1, %v90_v22, 0.0 }
  0x34   :  { %v130_v37 = vsel %vm116_vm1, %v107_v32, 0.0 }
  0x35   :  { %v121_v29 = vadd.f32 %v120_v24, %v119_v25 }
  0x37   :  { %v123_v31 = vadd.f32 %v122_v28, %v121_v29 }
  0x39   :  { %v125_v34 = vadd.f32 %v124_v30, %v123_v31 }
  0x3b   :  { %v127_v36 = vadd.f32 %v126_v33, %v125_v34 }
  0x3d   :  { %v129_v38 = vadd.f32 %v128_v35, %v127_v36 }
  0x3f   :  { %v131_v39 = vadd.f32 %v130_v37, %v129_v38 }
  0x41   :  { %132 = vadd.xlane.f32.xlu0 %v131_v39 }
  0xce   :  { %v133_v41 = vpop.xlane.xlu0 %132 }
  0xcf   :  { %v134_v42 = vadd.f32 %v133_v41, %v71_v40 }
  0xd1   :  { %136 = vst.msk [vmem:[%s269_s2] sm:$0x3] %vm61_vm0, %v134_v42 }
  0xd2   :  { %141 = vsyncpa [#allocation3], 1 }
  0xd3   :  { %142 = vsyncpa [#allocation5], 1 }

</bundles_post_ra>
